<compile_context>
chip_gen: v7x
topology: tpu7x:2x2x1
jax: 0.10.0
libtpu: 0.0.40
codegen_flags: <defaults>
</compile_context>

<pallas_src>
import jax
import jax.numpy as jnp
import numpy as np
from jax.experimental import pallas as pl
from jax.experimental.pallas import tpu as pltpu


def _round_up(v, m):
    return (v + m - 1) // m * m


def _proj_kernel(x_ref, wcat_ref, b_ref, h_ref, r_ref):
    # [H | R] = X @ [Wl^T | Wr^T]; bias is added only to the R (root/Wr) half.
    p = jnp.dot(x_ref[...], wcat_ref[...], preferred_element_type=jnp.float32)
    d = h_ref.shape[-1]                       # Dout_pad (multiple of 128 -> aligned slice)
    h_ref[...] = p[:, :d].astype(h_ref.dtype)
    r_ref[...] = p[:, d:] + b_ref[...]


def _agg_kernel(a_ref, h_ref, deg_ref, r_ref, o_ref, acc_ref):
    k = pl.program_id(1)

    @pl.when(k == 0)
    def _():
        acc_ref[...] = jnp.zeros_like(acc_ref)

    # MXU accumulate: (tm, tk) @ (tk, Dout_pad), bf16 inputs, f32 accumulation.
    acc_ref[...] += jnp.dot(a_ref[...], h_ref[...],
                            preferred_element_type=jnp.float32)

    @pl.when(k == pl.num_programs(1) - 1)
    def _():
        # Exact f32 1/deg (approx=True would offload to the EUP but costs ~2^-12
        # relative error; exact keeps the f32 path within 1e-4 of the reference).
        inv_deg = pl.reciprocal(deg_ref[...])
        o_ref[...] = (acc_ref[...] * inv_deg + r_ref[...]).astype(o_ref.dtype)


def sage_conv_pallas(x, edge_index, w_l, w_r, bias, *, agg_dtype=jnp.bfloat16):
    """SAGEConv(mean) forward.

    x: [N, Din] f32, edge_index: [2, E] int32 (row0 = src, row1 = dst),
    w_l / w_r: [Dout, Din] (PyTorch Linear layout), bias: [Dout] or None.
    """
    n, d_in = x.shape
    d_out = w_l.shape[0]
    if bias is None:
        bias = jnp.zeros((d_out,), jnp.float32)

    # ---- tile / padding selection (tm | tk | n_pad; all (8,128)-friendly) ----
    tk = min(512, _round_up(n, 128))
    tm = 256 if (tk % 256 == 0 and tk >= 256) else min(tk, 128)
    n_pad = _round_up(n, tk)
    d_in_pad = _round_up(d_in, 128)
    d_out_pad = _round_up(d_out, 128)

    # ---- glue: padded operands -------------------------------------------
    xf = x.astype(jnp.float32)
    x_pad = jnp.pad(xf, ((0, n_pad - n), (0, d_in_pad - d_in)))

    wl_t = jnp.pad(w_l.T.astype(jnp.float32),
                   ((0, d_in_pad - d_in), (0, d_out_pad - d_out)))
    wr_t = jnp.pad(w_r.T.astype(jnp.float32),
                   ((0, d_in_pad - d_in), (0, d_out_pad - d_out)))
    w_cat = jnp.concatenate([wl_t, wr_t], axis=1)           # [Din_p, 2*Dout_p]
    b2d = jnp.pad(bias.astype(jnp.float32),
                  (0, d_out_pad - d_out)).reshape(1, d_out_pad)

    # Dense adjacency COUNTS (normalized later, inside the kernel).
    # Counts are tiny integers -> exact in bf16.
    # TODO(synk): for realistic sparse graphs replace this O(N^2) dense build +
    # A@H with a CSR gather/segment-mean kernel using scalar-prefetched row
    # offsets; the dense formulation is only intended for small/dense N.
    src = edge_index[0]
    dst = edge_index[1]
    a_count = jnp.zeros((n_pad, n_pad), jnp.float32).at[dst, src].add(1.0)
    deg = jnp.maximum(jnp.sum(a_count, axis=1, keepdims=True), 1.0)   # [n_pad,1] f32
    a_count = a_count.astype(agg_dtype)

    itemsize = jnp.dtype(agg_dtype).itemsize

    # ---- kernel 1: fused projection  [H | R] = X @ [Wl | Wr] (+ bias on R) ----
    proj_cost = pl.CostEstimate(
        flops=2 * n_pad * d_in_pad * 2 * d_out_pad,
        transcendentals=0,
        bytes_accessed=(n_pad * d_in_pad * 4 + d_in_pad * 2 * d_out_pad * 4
                        + n_pad * d_out_pad * (itemsize + 4)))
    h, r = pl.pallas_call(
        _proj_kernel,
        out_shape=(jax.ShapeDtypeStruct((n_pad, d_out_pad), agg_dtype),
                   jax.ShapeDtypeStruct((n_pad, d_out_pad), jnp.float32)),
        grid_spec=pltpu.PrefetchScalarGridSpec(
            num_scalar_prefetch=0,
            grid=(n_pad // tm,),
            in_specs=[
                pl.BlockSpec((tm, d_in_pad), lambda i: (i, 0)),
                pl.BlockSpec((d_in_pad, 2 * d_out_pad), lambda i: (0, 0)),
                pl.BlockSpec((1, d_out_pad), lambda i: (0, 0)),
            ],
            out_specs=[
                pl.BlockSpec((tm, d_out_pad), lambda i: (i, 0)),
                pl.BlockSpec((tm, d_out_pad), lambda i: (i, 0)),
            ]),
        compiler_params=pltpu.CompilerParams(
            dimension_semantics=("parallel",)),
        cost_estimate=proj_cost,
    )(x_pad, w_cat, b2d)

    # ---- kernel 2: tiled mean-aggregation + finalize --------------------------
    agg_cost = pl.CostEstimate(
        flops=2 * n_pad * n_pad * d_out_pad,
        transcendentals=0,
        bytes_accessed=(n_pad * n_pad * itemsize
                        + n_pad * d_out_pad * (itemsize + 4 + 4) + n_pad * 4))
    out_pad = pl.pallas_call(
        _agg_kernel,
        out_shape=jax.ShapeDtypeStruct((n_pad, d_out_pad), jnp.float32),
        grid_spec=pltpu.PrefetchScalarGridSpec(
            num_scalar_prefetch=0,
            grid=(n_pad // tm, n_pad // tk),
            in_specs=[
                pl.BlockSpec((tm, tk), lambda i, k: (i, k)),          # A counts
                pl.BlockSpec((tk, d_out_pad), lambda i, k: (k, 0)),   # H = X @ Wl^T
                pl.BlockSpec((tm, 1), lambda i, k: (i, 0)),           # deg
                pl.BlockSpec((tm, d_out_pad), lambda i, k: (i, 0)),   # R = X @ Wr^T + b
            ],
            out_specs=pl.BlockSpec((tm, d_out_pad), lambda i, k: (i, 0)),
            scratch_shapes=[pltpu.VMEM((tm, d_out_pad), jnp.float32)]),
        compiler_params=pltpu.CompilerParams(
            dimension_semantics=("parallel", "arbitrary")),
        cost_estimate=agg_cost,
    )(a_count, h, deg, r)

    return out_pad[:n, :d_out]


def sage_conv_ref(x, edge_index, w_l, w_r, bias):
    """Pure-JAX f32 reference mirroring PyG SAGEConv(mean, root_weight=True)."""
    n = x.shape[0]
    src, dst = edge_index[0], edge_index[1]
    summed = jnp.zeros((n, x.shape[1]), jnp.float32).at[dst].add(x[src])
    cnt = jnp.zeros((n, 1), jnp.float32).at[dst].add(1.0)
    agg = summed / jnp.maximum(cnt, 1.0)
    return agg @ w_l.T + x @ w_r.T + bias[None, :]


if __name__ == "__main__":
    key = jax.random.PRNGKey(0)
    N, E = 16, 48          # nodes, edges
    DIM_IN, DIM_OUT = 32, 32

    k_x, k_e1, k_e2, k_wl, k_wr, k_b = jax.random.split(key, 6)
    x = jax.random.normal(k_x, (N, DIM_IN), jnp.float32)
    edge_index = jnp.stack(
        [jax.random.randint(k_e1, (E,), 0, N),
         jax.random.randint(k_e2, (E,), 0, N)], axis=0).astype(jnp.int32)

    # Deterministic parameter init (shapes from SAGEConv(dim_in, dim_out, bias=True)).
    scale = 1.0 / jnp.sqrt(jnp.float32(DIM_IN))
    w_l = jax.random.uniform(k_wl, (DIM_OUT, DIM_IN), jnp.float32, -scale, scale)
    w_r = jax.random.uniform(k_wr, (DIM_OUT, DIM_IN), jnp.float32, -scale, scale)
    bias = jax.random.uniform(k_b, (DIM_OUT,), jnp.float32, -scale, scale)

    ref = sage_conv_ref(x, edge_index, w_l, w_r, bias)

    # f32 feature path: matches the f32 PyTorch module to tight tolerance.
    out_f32 = jax.block_until_ready(
        sage_conv_pallas(x, edge_index, w_l, w_r, bias, agg_dtype=jnp.float32))
    np.testing.assert_allclose(np.asarray(out_f32), np.asarray(ref),
                               atol=1e-4, rtol=1e-4)

    # Default bf16 feature path (bf16 A/H on the MXU fast path, f32 accumulation
    # and f32 1/deg + bias epilogue): bf16-level tolerance.
    out_bf16 = jax.block_until_ready(
        sage_conv_pallas(x, edge_index, w_l, w_r, bias))
    np.testing.assert_allclose(np.asarray(out_bf16), np.asarray(ref),
                               atol=2e-2, rtol=2e-2)

    print("KERNEL_OK")
</pallas_src>

<mosaic_0001>
module attributes {stable_mosaic.version = 11 : i64} {
  func.func @_proj_kernel(%arg0: i32, %arg1: memref<128x128xf32, #tpu.memory_space<vmem>>, %arg2: memref<128x256xf32, #tpu.memory_space<vmem>>, %arg3: memref<1x128xf32, #tpu.memory_space<vmem>>, %arg4: memref<128x128xf32, #tpu.memory_space<vmem>>, %arg5: memref<128x128xf32, #tpu.memory_space<vmem>>) attributes {dimension_semantics = [#tpu.dimension_semantics<parallel>], iteration_bounds = array<i64: 1>, scalar_prefetch = 0 : i64, scratch_operands = 0 : i64, tpu.core_type = #tpu.core_type<tc>, window_params = [{transform_indices = @transform_0, window_bounds = array<i64: 128, 128>}, {pipeline_mode = #tpu.pipeline_mode<synchronous>, transform_indices = @transform_1, window_bounds = array<i64: 128, 256>}, {pipeline_mode = #tpu.pipeline_mode<synchronous>, transform_indices = @transform_2, window_bounds = array<i64: 1, 128>}, {transform_indices = @transform_3, window_bounds = array<i64: 128, 128>}, {transform_indices = @transform_4, window_bounds = array<i64: 128, 128>}]} {
    %c0 = arith.constant 0 : index
    %c0_0 = arith.constant 0 : index
    %0 = vector.load %arg1[%c0, %c0_0] : memref<128x128xf32, #tpu.memory_space<vmem>>, vector<128x128xf32>
    %c0_1 = arith.constant 0 : index
    %c0_2 = arith.constant 0 : index
    %1 = vector.load %arg2[%c0_1, %c0_2] : memref<128x256xf32, #tpu.memory_space<vmem>>, vector<128x256xf32>
    %cst = arith.constant dense<0.000000e+00> : vector<128x256xf32>
    %2 = tpu.matmul %0, %1, %cst {dimension_numbers = #tpu.dot_dimension_numbers<[1], [0], [0], [1], [0, 0, 1, 1], [], []>} : vector<128x128xf32>, vector<128x256xf32>, vector<128x256xf32> -> vector<128x256xf32>
    %3 = vector.extract_strided_slice %2 {offsets = [0, 0], sizes = [128, 128], strides = [1, 1]} : vector<128x256xf32> to vector<128x128xf32>
    %c0_3 = arith.constant 0 : index
    %c0_4 = arith.constant 0 : index
    %4 = vector.load %arg4[%c0_3, %c0_4] : memref<128x128xf32, #tpu.memory_space<vmem>>, vector<128x128xf32>
    tpu.vector_store %arg4[%c0_3, %c0_4], %3 {strides = array<i32>} : memref<128x128xf32, #tpu.memory_space<vmem>>, vector<128x128xf32>,
    %5 = vector.extract_strided_slice %2 {offsets = [0, 128], sizes = [128, 128], strides = [1, 1]} : vector<128x256xf32> to vector<128x128xf32>
    %c0_5 = arith.constant 0 : index
    %c0_6 = arith.constant 0 : index
    %6 = vector.load %arg3[%c0_5, %c0_6] : memref<1x128xf32, #tpu.memory_space<vmem>>, vector<1x128xf32>
    %7 = vector.broadcast %6 : vector<1x128xf32> to vector<128x128xf32>
    %8 = arith.addf %5, %7 : vector<128x128xf32>
    %c0_7 = arith.constant 0 : index
    %c0_8 = arith.constant 0 : index
    %9 = vector.load %arg5[%c0_7, %c0_8] : memref<128x128xf32, #tpu.memory_space<vmem>>, vector<128x128xf32>
    tpu.vector_store %arg5[%c0_7, %c0_8], %8 {strides = array<i32>} : memref<128x128xf32, #tpu.memory_space<vmem>>, vector<128x128xf32>,
    return
  }
  func.func @transform_0(%arg0: i32) -> (i32, i32) {
    %c0_i32 = arith.constant 0 : i32
    %c0_i32_0 = arith.constant 0 : i32
    return %arg0, %c0_i32 : i32, i32
  }
  func.func @transform_1(%arg0: i32) -> (i32, i32) {
    %c0_i32 = arith.constant 0 : i32
    %c0_i32_0 = arith.constant 0 : i32
    %c0_i32_1 = arith.constant 0 : i32
    return %c0_i32, %c0_i32_0 : i32, i32
  }
  func.func @transform_2(%arg0: i32) -> (i32, i32) {
    %c0_i32 = arith.constant 0 : i32
    %c0_i32_0 = arith.constant 0 : i32
    %c0_i32_1 = arith.constant 0 : i32
    return %c0_i32, %c0_i32_0 : i32, i32
  }
  func.func @transform_3(%arg0: i32) -> (i32, i32) {
    %c0_i32 = arith.constant 0 : i32
    %c0_i32_0 = arith.constant 0 : i32
    return %arg0, %c0_i32 : i32, i32
  }
  func.func @transform_4(%arg0: i32) -> (i32, i32) {
    %c0_i32 = arith.constant 0 : i32
    %c0_i32_0 = arith.constant 0 : i32
    return %arg0, %c0_i32 : i32, i32
  }
}

</mosaic_0001>

<bundles_post_ra>
// kernel: tpu_custom_call.1
= control target key start
LH: loop header
LB: loop body
LE: loop exit
PB: predicated region body
PF: predicated region fallthrough
CT: control target
= control target key end

     0   :  { %10 = vsyncpa [#allocation3], 0  ;;  %s633_s0 = inlined_call_operand.hbm [shape: f32[128,128], index: 0, kind: input, shape index: {}]   ;;  %s634_s1 = inlined_call_operand.hbm [shape: f32[128,256], index: 1, kind: input, shape index: {}]   ;;  %s635_s2 = inlined_call_operand.vmem [shape: f32[1,128], index: 2, kind: input, shape index: {}]   ;;  %s636_s3 = inlined_call_operand.hbm [shape: f32[128,128], index: 3, kind: output, shape index: {0}]   ;;  %s637_s4 = inlined_call_operand.hbm [shape: f32[128,128], index: 4, kind: output, shape index: {1}]  }
   0x1   :  { %11 = vsyncpa [#allocation6], 0 }
   0x2   :  { %12 = vsyncpa [#allocation4], 0 }
   0x3   :  { %13 = vsyncpa [#allocation9], 0  ;;  %s498_s15 = smov [#allocation2]   ;;  %s402_s19 = scalar_lea.hbm %s633_s0, 2048 }
   0x4   :  { %s19_s16 = sshll.u32 %s498_s15, 4  ;;  %p403_p0 = scmp.ne.s32.totalorder %s633_s0, %s402_s19  ;;  %s20_s16 = int_to_ptr.vmem [resolvable:$true] %s19_s16 }
   0x5   :  { %p406_p1 = scmp.lt.u32.totalorder %s402_s19, %s633_s0 }
   0x7   :  { %p408_p2 = pnand %p406_p1, %p403_p0 }
   0x9   :  { %411 = shalt.err (!%p408_p2)
}
   0xa   :  { %s412_s24 = scalar_lea.vmem %s20_s16, 2048  ;;  %p417_p4 = scmp.lt.s32.totalorder %s20_s16, %s20_s16 }
   0xb   :  { %p413_p3 = scmp.ne.s32.totalorder %s20_s16, %s412_s24  ;;  %p418_p5 = scmp.lt.s32.totalorder %s412_s24, %s412_s24 }
   0xd   :  { %p419_p6 = por %p418_p5, %p417_p4 }
   0xf   :  { %p420_p7 = pnand %p419_p6, %p413_p3 }
  0x11   :  { %423 = shalt.err (!%p420_p7)
}
  0x12   :  { %s499_s25 = smov 128   ;;  %s500_s26 = smov 8  }
  0x13   :  { %25 = dma.hbm_to_vmem [thread:$0]  %s633_s0, 2048, %s20_s16, [#allocation3], %s499_s25, %s499_s25, %s500_s26  }
  0x14   :  { %s501_s29 = smov [#allocation5]   ;;  %s424_s7 = scalar_lea.hbm %s634_s1, 4096 }
  0x15   :  { %s31_s30 = sshll.u32 %s501_s29, 4  ;;  %p425_p8 = scmp.ne.s32.totalorder %s634_s1, %s424_s7  ;;  %s32_s30 = int_to_ptr.vmem [resolvable:$true] %s31_s30 }
  0x16   :  { %p428_p9 = scmp.lt.u32.totalorder %s424_s7, %s634_s1 }
  0x18   :  { %p430_p10 = pnand %p428_p9, %p425_p8 }
  0x1a   :  { %433 = shalt.err (!%p430_p10)
}
  0x1b   :  { %s434_s12 = scalar_lea.vmem %s32_s30, 4096  ;;  %p439_p12 = scmp.lt.s32.totalorder %s32_s30, %s32_s30 }
  0x1c   :  { %p435_p11 = scmp.ne.s32.totalorder %s32_s30, %s434_s12  ;;  %p440_p13 = scmp.lt.s32.totalorder %s434_s12, %s434_s12 }
  0x1e   :  { %p441_p0 = por %p440_p13, %p439_p12 }
  0x20   :  { %p442_p1 = pnand %p441_p0, %p435_p11 }
  0x22   :  { %445 = shalt.err (!%p442_p1)
}
  0x23   :  { %s502_s0 = smov 256   ;;  %s503_s13 = smov 16  }
  0x24   :  { %37 = dma.hbm_to_vmem [thread:$0]  %s634_s1, 4096, %s32_s30, [#allocation6], %s502_s0, %s502_s0, %s503_s13  }
  0x25   :  { %490 = dma.done.wait [#allocation3], 2048  }
  0x26   :  { %491 = vsyncadd [#allocation3], 4294965248 }
  0x27   :  { %492 = dma.done.wait [#allocation6], 4096  }
  0x28   :  { %493 = vsyncadd [#allocation6], 4294963200  ;;  %v504_v0 = vmov 0.0   ;;  %v63_v1 = vld [vmem:[#allocation5 + $0x8] sm:$0xff]  ;;  %v65_v2 = vld [vmem:[#allocation5 + $0x18] sm:$0xff]  ;;  %s506_s18 = smov [#allocation8]  }
  0x29   :  { %158 = vmatprep.mubr.f32.mxu0 %v504_v0  ;;  %206 = vmatprep.mubr.f32.mxu1 %v504_v0  ;;  %v62_v3 = vld [vmem:[#allocation5] sm:$0xff]  ;;  %v345_v4 = vpack.c.bf16 %v65_v2, %v63_v1  ;;  %v64_v5 = vld [vmem:[#allocation5 + $0x10] sm:$0xff]  ;;  %v67_v6 = vld [vmem:[#allocation5 + $0x28] sm:$0xff]  ;;  %s327_s19 = sshll.u32 %s506_s18, 4  ;;  %s594_s19 = int_to_ptr.vmem [resolvable:$true] %s327_s19 }
  0x2a   :  { %v69_v7 = vld [vmem:[#allocation5 + $0x38] sm:$0xff]  ;;  %v347_v8 = vpack.c.bf16 %v64_v5, %v62_v3  ;;  %v66_v10 = vld [vmem:[#allocation5 + $0x20] sm:$0xff]  ;;  %v68_v11 = vld [vmem:[#allocation5 + $0x30] sm:$0xff] }
  0x2b   :  { %v349_v9 = vpack.c.bf16 %v69_v7, %v67_v6  ;;  %v71_v12 = vld [vmem:[#allocation5 + $0x48] sm:$0xff]  ;;  %346 = vmatprep.subr.bf16.mxu0 %v345_v4  ;;  %377 = vmatprep.subr.bf16.mxu1 %v345_v4  ;;  %v73_v13 = vld [vmem:[#allocation5 + $0x58] sm:$0xff]  ;;  %v351_v14 = vpack.c.bf16 %v68_v11, %v66_v10  ;;  %v70_v16 = vld [vmem:[#allocation5 + $0x40] sm:$0xff] }
  0x2c   :  { %348 = vmatpush1.bf16.msra.mxu0 %v347_v8  ;;  %385 = vmatpush1.bf16.msra.mxu1 %v347_v8  ;;  %v353_v15 = vpack.c.bf16 %v73_v13, %v71_v12  ;;  %v72_v17 = vld [vmem:[#allocation5 + $0x50] sm:$0xff]  ;;  %v75_v18 = vld [vmem:[#allocation5 + $0x68] sm:$0xff]  ;;  %v77_v19 = vld [vmem:[#allocation5 + $0x78] sm:$0xff] }
  0x2d   :  { %350 = vmatprep.subr.bf16.mxu0 %v349_v9  ;;  %378 = vmatprep.subr.bf16.mxu1 %v349_v9  ;;  %v355_v20 = vpack.c.bf16 %v72_v17, %v70_v16  ;;  %v357_v21 = vpack.c.bf16 %v77_v19, %v75_v18  ;;  %v74_v22 = vld [vmem:[#allocation5 + $0x60] sm:$0xff]  ;;  %v76_v23 = vld [vmem:[#allocation5 + $0x70] sm:$0xff]  ;;  %v79_v24 = vld [vmem:[#allocation5 + $0x88] sm:$0xff] }
  0x2e   :  { %v81_v25 = vld [vmem:[#allocation5 + $0x98] sm:$0xff]  ;;  %v359_v26 = vpack.c.bf16 %v76_v23, %v74_v22  ;;  %v78_v28 = vld [vmem:[#allocation5 + $0x80] sm:$0xff]  ;;  %v80_v29 = vld [vmem:[#allocation5 + $0x90] sm:$0xff] }
  0x2f   :  { %v361_v27 = vpack.c.bf16 %v81_v25, %v79_v24  ;;  %v83_v30 = vld [vmem:[#allocation5 + $0xa8] sm:$0xff]  ;;  %v85_v31 = vld [vmem:[#allocation5 + $0xb8] sm:$0xff]  ;;  %v363_v32 = vpack.c.bf16 %v80_v29, %v78_v28  ;;  %v82_v34 = vld [vmem:[#allocation5 + $0xa0] sm:$0xff] }
  0x30   :  { %352 = vmatpush1.bf16.msra.mxu0 %v351_v14  ;;  %386 = vmatpush1.bf16.msra.mxu1 %v351_v14  ;;  %v365_v33 = vpack.c.bf16 %v85_v31, %v83_v30  ;;  %v84_v35 = vld [vmem:[#allocation5 + $0xb0] sm:$0xff]  ;;  %v87_v36 = vld [vmem:[#allocation5 + $0xc8] sm:$0xff]  ;;  %v89_v37 = vld [vmem:[#allocation5 + $0xd8] sm:$0xff] }
  0x31   :  { %354 = vmatprep.subr.bf16.mxu0 %v353_v15  ;;  %379 = vmatprep.subr.bf16.mxu1 %v353_v15  ;;  %v367_v38 = vpack.c.bf16 %v84_v35, %v82_v34  ;;  %v369_v39 = vpack.c.bf16 %v89_v37, %v87_v36  ;;  %v86_v40 = vld [vmem:[#allocation5 + $0xc0] sm:$0xff]  ;;  %v88_v41 = vld [vmem:[#allocation5 + $0xd0] sm:$0xff]  ;;  %v91_v42 = vld [vmem:[#allocation5 + $0xe8] sm:$0xff] }
  0x32   :  { %v93_v43 = vld [vmem:[#allocation5 + $0xf8] sm:$0xff]  ;;  %v371_v44 = vpack.c.bf16 %v88_v41, %v86_v40  ;;  %v90_v46 = vld [vmem:[#allocation5 + $0xe0] sm:$0xff]  ;;  %v92_v47 = vld [vmem:[#allocation5 + $0xf0] sm:$0xff] }
  0x33   :  { %v373_v45 = vpack.c.bf16 %v93_v43, %v91_v42  ;;  %v375_v48 = vpack.c.bf16 %v92_v47, %v90_v46  ;;  %v46_v49 = vld [vmem:[#allocation2] sm:$0xff]  ;;  %v47_v51 = vld [vmem:[#allocation2 + $0x8] sm:$0xff]  ;;  %v48_v53 = vld [vmem:[#allocation2 + $0x10] sm:$0xff] }
  0x34   :  { %356 = vmatpush1.bf16.msra.mxu0 %v355_v20  ;;  %387 = vmatpush1.bf16.msra.mxu1 %v355_v20  ;;  %v54_v50 = vld [vmem:[#allocation2 + $0x40] sm:$0xff]  ;;  %v55_v52 = vld [vmem:[#allocation2 + $0x48] sm:$0xff]  ;;  %v56_v54 = vld [vmem:[#allocation2 + $0x50] sm:$0xff] }
  0x35   :  { %358 = vmatprep.subr.bf16.mxu0 %v357_v21  ;;  %380 = vmatprep.subr.bf16.mxu1 %v357_v21  ;;  %v49_v55 = vld [vmem:[#allocation2 + $0x18] sm:$0xff]  ;;  %v50_v57 = vld [vmem:[#allocation2 + $0x20] sm:$0xff]  ;;  %v51_v59 = vld [vmem:[#allocation2 + $0x28] sm:$0xff] }
  0x36   :  { %v57_v56 = vld [vmem:[#allocation2 + $0x58] sm:$0xff]  ;;  %v58_v58 = vld [vmem:[#allocation2 + $0x60] sm:$0xff]  ;;  %v59_v60 = vld [vmem:[#allocation2 + $0x68] sm:$0xff] }
  0x37   :  { %v52_v61 = vld [vmem:[#allocation2 + $0x30] sm:$0xff]  ;;  %v53_v63 = vld [vmem:[#allocation2 + $0x38] sm:$0xff]  ;;  %v578_v2 = vld [vmem:[%s635_s2] ss:$0 sm:$0xff]  ;;  %s505_s2 = smov [#allocation7]  }
  0x38   :  { %360 = vmatpush1.bf16.msra.mxu0 %v359_v26  ;;  %388 = vmatpush1.bf16.msra.mxu1 %v359_v26  ;;  %v60_v62 = vld [vmem:[#allocation2 + $0x70] sm:$0xff]  ;;  %v61_v1 = vld [vmem:[#allocation2 + $0x78] sm:$0xff]  ;;  %s315_s17 = sshll.u32 %s505_s2, 4  ;;  %s316_s17 = int_to_ptr.vmem [resolvable:$true] %s315_s17 }
  0x39   :  { %362 = vmatprep.subr.bf16.mxu0 %v361_v27  ;;  %381 = vmatprep.subr.bf16.mxu1 %v361_v27  ;;  %s446_s20 = scalar_lea.vmem %s316_s17, 2048  ;;  %p451_p3 = scmp.lt.s32.totalorder %s316_s17, %s316_s17 }
  0x3a   :  { %p447_p2 = scmp.ne.s32.totalorder %s316_s17, %s446_s20  ;;  %p452_p4 = scmp.lt.s32.totalorder %s446_s20, %s446_s20 }
  0x3c   :  { %364 = vmatpush1.bf16.msra.mxu0 %v363_v32  ;;  %389 = vmatpush1.bf16.msra.mxu1 %v363_v32  ;;  %p453_p5 = por %p452_p4, %p451_p3 }
  0x3d   :  { %366 = vmatprep.subr.bf16.mxu0 %v365_v33  ;;  %382 = vmatprep.subr.bf16.mxu1 %v365_v33 }
  0x3e   :  { %p454_p6 = pnand %p453_p5, %p447_p2 }
  0x40   :  { %368 = vmatpush1.bf16.msra.mxu0 %v367_v38  ;;  %390 = vmatpush1.bf16.msra.mxu1 %v367_v38 }
  0x41   :  { %370 = vmatprep.subr.bf16.mxu0 %v369_v39  ;;  %383 = vmatprep.subr.bf16.mxu1 %v369_v39 }
  0x44   :  { %372 = vmatpush1.bf16.msra.mxu0 %v371_v44  ;;  %391 = vmatpush1.bf16.msra.mxu1 %v371_v44 }
  0x45   :  { %374 = vmatprep.subr.bf16.mxu0 %v373_v45  ;;  %384 = vmatprep.subr.bf16.mxu1 %v373_v45 }
  0x48   :  { %376 = vmatpush1.bf16.msra.mxu0 %v375_v48  ;;  %392 = vmatpush1.bf16.msra.mxu1 %v375_v48 }
  0x4b   :  { %159 = vmatmul.mubr.f32.vlgmr.msra.gmra.mrb[0].mxu0 %v46_v49  ;;  %207 = vmatmul.mubr.f32.vlgmr.msra.gmra.mrb[0].mxu1 %v54_v50 }
  0x4c   :  { %164 = vmatprep.mubr.f32.mxu0 %v504_v0  ;;  %212 = vmatprep.mubr.f32.mxu1 %v504_v0 }
  0x4f   :  { %165 = vmatmul.mubr.f32.gmra.mrb[2].mxu0 %v47_v51  ;;  %213 = vmatmul.mubr.f32.gmra.mrb[2].mxu1 %v55_v52 }
  0x50   :  { %170 = vmatprep.mubr.f32.mxu0 %v504_v0  ;;  %218 = vmatprep.mubr.f32.mxu1 %v504_v0 }
  0x53   :  { %171 = vmatmul.mubr.f32.gmra.mrb[4].mxu0 %v48_v53  ;;  %219 = vmatmul.mubr.f32.gmra.mrb[4].mxu1 %v56_v54 }
  0x54   :  { %176 = vmatprep.mubr.f32.mxu0 %v504_v0  ;;  %224 = vmatprep.mubr.f32.mxu1 %v504_v0 }
  0x57   :  { %177 = vmatmul.mubr.f32.gmra.mrb[6].mxu0 %v49_v55  ;;  %225 = vmatmul.mubr.f32.gmra.mrb[6].mxu1 %v57_v56 }
  0x58   :  { %182 = vmatprep.mubr.f32.mxu0 %v504_v0  ;;  %230 = vmatprep.mubr.f32.mxu1 %v504_v0 }
  0x5b   :  { %183 = vmatmul.mubr.f32.gmra.mrb[8].mxu0 %v50_v57  ;;  %231 = vmatmul.mubr.f32.gmra.mrb[8].mxu1 %v58_v58 }
  0x5c   :  { %188 = vmatprep.mubr.f32.mxu0 %v504_v0  ;;  %236 = vmatprep.mubr.f32.mxu1 %v504_v0 }
  0x5f   :  { %189 = vmatmul.mubr.f32.gmra.mrb[10].mxu0 %v51_v59  ;;  %237 = vmatmul.mubr.f32.gmra.mrb[10].mxu1 %v59_v60 }
  0x60   :  { %194 = vmatprep.mubr.f32.mxu0 %v504_v0  ;;  %242 = vmatprep.mubr.f32.mxu1 %v504_v0 }
  0x63   :  { %195 = vmatmul.mubr.f32.gmra.mrb[12].mxu0 %v52_v61  ;;  %243 = vmatmul.mubr.f32.gmra.mrb[12].mxu1 %v60_v62 }
  0x64   :  { %200 = vmatprep.mubr.f32.mxu0 %v504_v0  ;;  %248 = vmatprep.mubr.f32.mxu1 %v504_v0 }
  0x67   :  { %201 = vmatmul.mubr.f32.gmra.mrb[14].mxu0 %v53_v63  ;;  %249 = vmatmul.mubr.f32.gmra.mrb[14].mxu1 %v61_v1 }
 0x11e   :  { %v160_v3 = vpop.f32.mrb[0].mxu0  ;;  %v208_v4 = vpop.f32.mrb[0].mxu1 }
 0x11f   :  { %255 = vst [vmem:[#allocation7] sm:$0xff] %v160_v3  ;;  %263 = vst [vmem:[#allocation7 + $0x40] sm:$0xff] %v208_v4  ;;  %v162_v5 = vpop.f32.mrb[1].mxu0  ;;  %v210_v6 = vpop.f32.mrb[1].mxu1 }
 0x120   :  { %v278_v7 = vadd.f32 %v578_v2, %v162_v5  ;;  %v286_v8 = vadd.f32 %v578_v2, %v210_v6 }
 0x122   :  { %294 = vst [vmem:[#allocation8] sm:$0xff] %v278_v7  ;;  %302 = vst [vmem:[#allocation8 + $0x40] sm:$0xff] %v286_v8  ;;  %v166_v0 = vpop.f32.mrb[2].mxu0  ;;  %v214_v9 = vpop.f32.mrb[2].mxu1 }
 0x123   :  { %256 = vst [vmem:[#allocation7 + $0x8] sm:$0xff] %v166_v0  ;;  %264 = vst [vmem:[#allocation7 + $0x48] sm:$0xff] %v214_v9  ;;  %v168_v10 = vpop.f32.mrb[3].mxu0  ;;  %v216_v11 = vpop.f32.mrb[3].mxu1 }
 0x124   :  { %v279_v12 = vadd.f32 %v578_v2, %v168_v10  ;;  %v287_v13 = vadd.f32 %v578_v2, %v216_v11 }
 0x126   :  { %295 = vst [vmem:[#allocation8 + $0x8] sm:$0xff] %v279_v12  ;;  %303 = vst [vmem:[#allocation8 + $0x48] sm:$0xff] %v287_v13  ;;  %v172_v14 = vpop.f32.mrb[4].mxu0  ;;  %v220_v15 = vpop.f32.mrb[4].mxu1 }
 0x127   :  { %257 = vst [vmem:[#allocation7 + $0x10] sm:$0xff] %v172_v14  ;;  %265 = vst [vmem:[#allocation7 + $0x50] sm:$0xff] %v220_v15  ;;  %v174_v16 = vpop.f32.mrb[5].mxu0  ;;  %v222_v17 = vpop.f32.mrb[5].mxu1 }
 0x128   :  { %v280_v18 = vadd.f32 %v578_v2, %v174_v16  ;;  %v288_v19 = vadd.f32 %v578_v2, %v222_v17 }
 0x12a   :  { %296 = vst [vmem:[#allocation8 + $0x10] sm:$0xff] %v280_v18  ;;  %304 = vst [vmem:[#allocation8 + $0x50] sm:$0xff] %v288_v19  ;;  %v178_v20 = vpop.f32.mrb[6].mxu0  ;;  %v226_v21 = vpop.f32.mrb[6].mxu1 }
 0x12b   :  { %258 = vst [vmem:[#allocation7 + $0x18] sm:$0xff] %v178_v20  ;;  %266 = vst [vmem:[#allocation7 + $0x58] sm:$0xff] %v226_v21  ;;  %v180_v22 = vpop.f32.mrb[7].mxu0  ;;  %v228_v23 = vpop.f32.mrb[7].mxu1 }
 0x12c   :  { %v281_v24 = vadd.f32 %v578_v2, %v180_v22  ;;  %v289_v25 = vadd.f32 %v578_v2, %v228_v23 }
 0x12e   :  { %297 = vst [vmem:[#allocation8 + $0x18] sm:$0xff] %v281_v24  ;;  %305 = vst [vmem:[#allocation8 + $0x58] sm:$0xff] %v289_v25  ;;  %v184_v26 = vpop.f32.mrb[8].mxu0  ;;  %v232_v27 = vpop.f32.mrb[8].mxu1 }
 0x12f   :  { %259 = vst [vmem:[#allocation7 + $0x20] sm:$0xff] %v184_v26  ;;  %267 = vst [vmem:[#allocation7 + $0x60] sm:$0xff] %v232_v27  ;;  %v186_v28 = vpop.f32.mrb[9].mxu0  ;;  %v234_v29 = vpop.f32.mrb[9].mxu1 }
 0x130   :  { %v282_v30 = vadd.f32 %v578_v2, %v186_v28  ;;  %v290_v31 = vadd.f32 %v578_v2, %v234_v29 }
 0x132   :  { %298 = vst [vmem:[#allocation8 + $0x20] sm:$0xff] %v282_v30  ;;  %306 = vst [vmem:[#allocation8 + $0x60] sm:$0xff] %v290_v31  ;;  %v190_v32 = vpop.f32.mrb[10].mxu0  ;;  %v238_v33 = vpop.f32.mrb[10].mxu1 }
 0x133   :  { %260 = vst [vmem:[#allocation7 + $0x28] sm:$0xff] %v190_v32  ;;  %268 = vst [vmem:[#allocation7 + $0x68] sm:$0xff] %v238_v33  ;;  %v192_v34 = vpop.f32.mrb[11].mxu0  ;;  %v240_v35 = vpop.f32.mrb[11].mxu1 }
 0x134   :  { %v283_v36 = vadd.f32 %v578_v2, %v192_v34  ;;  %v291_v37 = vadd.f32 %v578_v2, %v240_v35 }
 0x136   :  { %299 = vst [vmem:[#allocation8 + $0x28] sm:$0xff] %v283_v36  ;;  %307 = vst [vmem:[#allocation8 + $0x68] sm:$0xff] %v291_v37  ;;  %v196_v38 = vpop.f32.mrb[12].mxu0  ;;  %v244_v39 = vpop.f32.mrb[12].mxu1 }
 0x137   :  { %261 = vst [vmem:[#allocation7 + $0x30] sm:$0xff] %v196_v38  ;;  %269 = vst [vmem:[#allocation7 + $0x70] sm:$0xff] %v244_v39  ;;  %v198_v40 = vpop.f32.mrb[13].mxu0  ;;  %v246_v41 = vpop.f32.mrb[13].mxu1 }
 0x138   :  { %v284_v42 = vadd.f32 %v578_v2, %v198_v40  ;;  %v292_v43 = vadd.f32 %v578_v2, %v246_v41 }
 0x13a   :  { %300 = vst [vmem:[#allocation8 + $0x30] sm:$0xff] %v284_v42  ;;  %308 = vst [vmem:[#allocation8 + $0x70] sm:$0xff] %v292_v43  ;;  %v202_v44 = vpop.f32.mrb[14].mxu0  ;;  %v250_v45 = vpop.f32.mrb[14].mxu1 }
 0x13b   :  { %262 = vst [vmem:[#allocation7 + $0x38] sm:$0xff] %v202_v44  ;;  %270 = vst [vmem:[#allocation7 + $0x78] sm:$0xff] %v250_v45  ;;  %v204_v46 = vpop.f32.mrb[15].mxu0  ;;  %v252_v47 = vpop.f32.mrb[15].mxu1 }
 0x13c   :  { %v285_v48 = vadd.f32 %v578_v2, %v204_v46  ;;  %v293_v49 = vadd.f32 %v578_v2, %v252_v47 }
 0x13d   :  { %457 = shalt.err (!%p454_p6)
}
 0x13e   :  { %s458_s23 = scalar_lea.hbm %s636_s3, 2048 }
 0x13f   :  { %p459_p7 = scmp.ne.s32.totalorder %s636_s3, %s458_s23  ;;  %p462_p8 = scmp.lt.u32.totalorder %s458_s23, %s636_s3 }
 0x141   :  { %p464_p9 = pnand %p462_p8, %p459_p7 }
 0x143   :  { %467 = shalt.err (!%p464_p9)
}
 0x144   :  { %321 = dma.vmem_to_hbm [thread:$0]  %s316_s17, 2048, %s636_s3, [#allocation4], %s499_s25, %s499_s25, %s500_s26   ;;  %301 = vst [vmem:[#allocation8 + $0x38] sm:$0xff] %v285_v48  ;;  %309 = vst [vmem:[#allocation8 + $0x78] sm:$0xff] %v293_v49 }
 0x145   :  { %s468_s6 = scalar_lea.vmem %s594_s19, 2048  ;;  %p473_p11 = scmp.lt.s32.totalorder %s594_s19, %s594_s19 }
 0x146   :  { %p469_p10 = scmp.ne.s32.totalorder %s594_s19, %s468_s6  ;;  %p474_p12 = scmp.lt.s32.totalorder %s468_s6, %s468_s6 }
 0x148   :  { %p475_p13 = por %p474_p12, %p473_p11 }
 0x14a   :  { %p476_p0 = pnand %p475_p13, %p469_p10 }
 0x14c   :  { %479 = shalt.err (!%p476_p0)
}
 0x14d   :  { %s480_s9 = scalar_lea.hbm %s637_s4, 2048 }
 0x14e   :  { %p481_p1 = scmp.ne.s32.totalorder %s637_s4, %s480_s9  ;;  %p484_p2 = scmp.lt.u32.totalorder %s480_s9, %s637_s4 }
 0x150   :  { %p486_p3 = pnand %p484_p2, %p481_p1 }
 0x152   :  { %489 = shalt.err (!%p486_p3)
}
 0x153   :  { %333 = dma.vmem_to_hbm [thread:$0]  %s594_s19, 2048, %s637_s4, [#allocation9], %s499_s25, %s499_s25, %s500_s26  }
 0x154   :  { %494 = dma.done.wait [#allocation4], 2048  }
 0x155   :  { %495 = vsyncadd [#allocation4], 4294965248 }
 0x156   :  { %496 = dma.done.wait [#allocation9], 2048  }
 0x157   :  { %497 = vsyncadd [#allocation9], 4294965248 }
 0x158   :  { %340 = vsyncpa [#allocation3], 1 }
 0x159   :  { %341 = vsyncpa [#allocation6], 1 }
 0x15a   :  { %342 = vsyncpa [#allocation4], 1 }
 0x15b   :  { %343 = vsyncpa [#allocation9], 1 }

</bundles_post_ra>
